<compile_context>
chip_gen: v7x
topology: tpu7x:2x2x1
jax: 0.10.0
libtpu: 0.0.40
codegen_flags: <defaults>
</compile_context>

<pallas_src>
import functools

import jax
import jax.numpy as jnp
from jax.experimental import pallas as pl
from jax.experimental.pallas import tpu as pltpu


def _round_up(x, m):
    return ((x + m - 1) // m) * m


def _linear_ae_kernel(n_layers, compute_dtype, *refs):
    """refs = (x, Wt_0..Wt_{n-1}, Wd_0..Wd_{n-1}, bias_pack, out).

    Wt_i      : (in_pad_i, out_pad_i)  encoder weight, pre-transposed in the wrapper
    Wd_i      : (out_pad_i, in_pad_i)  original PyTorch Linear layout (tied decoder)
    bias_pack : (2*n, Dmax_pad)        rows 0..n-1 encoder biases, rows n..2n-1 decoder biases
    All feature dims are zero-padded to multiples of 128 (lane-dense).
    """
    x_ref = refs[0]
    wt_refs = refs[1:1 + n_layers]
    wd_refs = refs[1 + n_layers:1 + 2 * n_layers]
    b_ref = refs[1 + 2 * n_layers]
    o_ref = refs[-1]

    h = x_ref[...]                               # (TB, in_pad_0) f32

    # ---- encoder: Linear -> ReLU -> (dropout = identity, eval mode) ----
    for i in range(n_layers):
        w = wt_refs[i][...]                      # (in_pad, out_pad), pre-transposed, bf16/f32
        out_pad = w.shape[1]
        h = jnp.dot(h.astype(compute_dtype), w, preferred_element_type=jnp.float32)
        # Per-row bias load at the point of use; epilogue stays f32 (v5e-safe).
        h = jnp.maximum(h + b_ref[i:i + 1, :out_pad], 0.0)

    # ---- symmetric decoder: tied, reversed encoder weights ----
    # weight_list reversed: decoder layer j uses W_{n-1-j}; F.linear(x, W^T) == x @ W.
    for j in range(n_layers - 1):
        w = wd_refs[n_layers - 1 - j][...]       # (out_pad, in_pad), original layout
        out_pad = w.shape[1]
        h = jnp.dot(h.astype(compute_dtype), w, preferred_element_type=jnp.float32)
        h = jnp.maximum(h + b_ref[n_layers + j:n_layers + j + 1, :out_pad], 0.0)

    w0 = wd_refs[0][...]
    logits = jnp.dot(h.astype(compute_dtype), w0, preferred_element_type=jnp.float32)
    logits = logits + b_ref[2 * n_layers - 1:2 * n_layers, :w0.shape[1]]
    # exp/reciprocal run on the otherwise-idle EUP slot -> sigmoid is ~free in-kernel.
    o_ref[...] = jax.nn.sigmoid(logits).astype(o_ref.dtype)


def _const_spec(shape):
    """Grid-invariant operand: single-buffer it (2nd pipeline buffer is pure VMEM waste)."""
    try:
        return pl.BlockSpec(shape, lambda i: (0, 0), pipeline_mode=pl.Buffered(1))
    except TypeError:  # very old jax without pipeline_mode kwarg
        return pl.BlockSpec(shape, lambda i: (0, 0))


def linear_ae_forward(x, enc_weights, enc_biases, dec_biases, *,
                      batch_tile=None, compute_dtype=jnp.bfloat16):
    """Pallas forward for LinearAE(symmetry=True, bias=True), eval-mode dropout.

    x           : (B, input_dim_list[0]) float32
    enc_weights : list of (out_i, in_i)  float32  (PyTorch Linear layout)
    enc_biases  : list of (out_i,)       float32
    dec_biases  : list of (dim,)         float32  (the module's bias_list)
    compute_dtype : matmul operand dtype (bf16 default; pass jnp.float32 for exact parity)
    returns     : (B, input_dim_list[0]) float32
    """
    n = len(enc_weights)
    B, d0 = x.shape
    f32 = jnp.float32

    # input_dim_list recovered from the weight shapes.
    dims = [w.shape[1] for w in enc_weights] + [enc_weights[-1].shape[0]]
    assert dims[0] == d0
    dims_pad = [_round_up(d, 128) for d in dims]
    d0_pad = dims_pad[0]
    dmax_pad = max(dims_pad)

    # Pre-transposed (encoder) + original-layout (decoder) zero-padded weight copies,
    # cast to the MXU compute dtype (bf16 halves weight DMA + VMEM residency).
    wt_list, wd_list = [], []
    for i, w in enumerate(enc_weights):
        in_d, out_d = dims[i], dims[i + 1]
        in_p, out_p = dims_pad[i], dims_pad[i + 1]
        wf = w.astype(compute_dtype)
        wt_list.append(jnp.zeros((in_p, out_p), compute_dtype).at[:in_d, :out_d].set(wf.T))
        wd_list.append(jnp.zeros((out_p, in_p), compute_dtype).at[:out_d, :in_d].set(wf))

    # Pack all 2n tiny bias vectors into one lane-dense operand (one DMA instead of 2n).
    bias_pack = jnp.zeros((2 * n, dmax_pad), f32)
    for i, b in enumerate(enc_biases):
        bias_pack = bias_pack.at[i, :b.shape[0]].set(b.astype(f32))
    for j, b in enumerate(dec_biases):
        bias_pack = bias_pack.at[n + j, :b.shape[0]].set(b.astype(f32))

    # Batch tiling: up to 256 rows fills the 256-wide v6e/v7x MXU; split large single-step
    # batches in two so dimension_semantics=("parallel",) can shard across v7x's two TCs.
    if batch_tile is None:
        b8 = _round_up(B, 8)
        tb = min(256, b8)
        if b8 <= tb and b8 >= 128:
            tb = _round_up((b8 + 1) // 2, 8)     # >=2 grid steps -> both v7x TCs get work
    else:
        tb = batch_tile
    assert tb % 8 == 0, "batch tile must be a multiple of 8 sublanes"
    b_pad = _round_up(B, tb)

    # Skip the pad/slice HBM round trip entirely when shapes are already aligned.
    needs_pad = (d0_pad != d0) or (b_pad != B)
    if needs_pad:
        x_in = jnp.zeros((b_pad, d0_pad), f32).at[:B, :d0].set(x.astype(f32))
    else:
        x_in = x.astype(f32)

    # Explicit VMEM budget: double-buffered x/out tiles + single-buffered weights/bias
    # + headroom for live f32 activation temps, with a safety factor.
    w_bytes = sum(int(w.size) * w.dtype.itemsize for w in wt_list + wd_list)
    bias_bytes = int(bias_pack.size) * bias_pack.dtype.itemsize
    io_bytes = 2 * 2 * tb * d0_pad * 4           # x & out tiles, double-buffered, f32
    act_bytes = 4 * tb * dmax_pad * 4            # live activation headroom
    footprint = w_bytes + bias_bytes + io_bytes + act_bytes
    try:
        vmem_cap = int(pltpu.get_tpu_info().vmem_capacity_bytes)
    except Exception:
        vmem_cap = 64 * 1024 * 1024              # conservative (v7x per-TC VMEM)
    vmem_limit = int(min(max(2 * footprint, 32 << 20), (vmem_cap * 9) // 10))

    grid = (b_pad // tb,)
    # x is double-buffered by default; bump to pl.Buffered(3) only if profiling shows
    # exposed DMA (tiny hidden dims => per-tile compute shorter than the x-tile copy).
    in_specs = [pl.BlockSpec((tb, d0_pad), lambda i: (i, 0))]
    in_specs += [_const_spec(w.shape) for w in wt_list]
    in_specs += [_const_spec(w.shape) for w in wd_list]
    in_specs += [_const_spec(bias_pack.shape)]
    out_spec = pl.BlockSpec((tb, d0_pad), lambda i: (i, 0))

    out = pl.pallas_call(
        functools.partial(_linear_ae_kernel, n, compute_dtype),
        out_shape=jax.ShapeDtypeStruct((b_pad, d0_pad), f32),
        grid=grid,
        in_specs=in_specs,
        out_specs=out_spec,
        compiler_params=pltpu.CompilerParams(
            dimension_semantics=("parallel",),    # batch axis shards across v7x's 2 TCs
            vmem_limit_bytes=vmem_limit),
    )(x_in, *wt_list, *wd_list, bias_pack)

    return out[:B, :d0] if needs_pad else out


def _reference_forward(x, enc_weights, enc_biases, dec_biases):
    """Pure-JAX f32 reference mirroring the PyTorch forward (eval-mode dropout)."""
    h = x
    for w, b in zip(enc_weights, enc_biases):
        h = jnp.maximum(h @ w.T + b, 0.0)
    n = len(enc_weights)
    for j in range(n - 1):
        h = jnp.maximum(h @ enc_weights[n - 1 - j] + dec_biases[j], 0.0)
    return jax.nn.sigmoid(h @ enc_weights[0] + dec_biases[n - 1])


def _make_params(key, input_dim_list, batch):
    """Deterministic params matching the PyTorch module's init shapes."""
    n = len(input_dim_list) - 1
    keys = jax.random.split(key, 4 * n + 1)
    ki = iter(keys)

    x = jax.random.normal(next(ki), (batch, input_dim_list[0]), dtype=jnp.float32)

    enc_weights, enc_biases = [], []
    for i in range(n):
        fan_in = input_dim_list[i]
        fan_out = input_dim_list[i + 1]
        bound = 1.0 / (fan_in ** 0.5)
        enc_weights.append(
            jax.random.uniform(next(ki), (fan_out, fan_in), jnp.float32, -bound, bound))
        enc_biases.append(
            jax.random.uniform(next(ki), (fan_out,), jnp.float32, -bound, bound))

    # bias_list in the module: torch.rand(output_dim_list[i+1])  (uniform [0,1))
    output_dim_list = input_dim_list[::-1]
    dec_biases = []
    for i in range(n):
        dec_biases.append(
            jax.random.uniform(next(ki), (output_dim_list[i + 1],), jnp.float32, 0.0, 1.0))
    return x, enc_weights, enc_biases, dec_biases


if __name__ == "__main__":
    key = jax.random.PRNGKey(0)
    k1, k2, k3 = jax.random.split(key, 3)

    # Case 1: lane-aligned dims, small batch. f32 compute mode -> exact parity,
    # and exercises the pad-free fast path (no x_pad / output slice).
    x, ew, eb, db = _make_params(k1, input_dim_list=[128, 64, 32], batch=8)
    out_f32 = jax.block_until_ready(
        linear_ae_forward(x, ew, eb, db, compute_dtype=jnp.float32))
    ref = _reference_forward(x, ew, eb, db)
    assert out_f32.shape == ref.shape
    assert jnp.allclose(out_f32, ref, atol=1e-5, rtol=1e-5), "f32 mismatch (case 1)"

    # Same params, default bf16 MXU path -> relaxed tolerance vs the f32 reference.
    out_bf16 = jax.block_until_ready(linear_ae_forward(x, ew, eb, db))
    assert jnp.allclose(out_bf16, ref, atol=3e-2, rtol=3e-2), "bf16 mismatch (case 1)"

    # Case 2: non-128-multiple dims / ragged batch exercise the padding path.
    x2, ew2, eb2, db2 = _make_params(k2, input_dim_list=[72, 40], batch=5)
    out2 = jax.block_until_ready(linear_ae_forward(x2, ew2, eb2, db2))
    ref2 = _reference_forward(x2, ew2, eb2, db2)
    assert out2.shape == ref2.shape
    assert jnp.allclose(out2, ref2, atol=3e-2, rtol=3e-2), "mismatch vs reference (case 2)"

    # Case 3: batch large enough for a multi-step grid (exercises tiling + batch padding).
    x3, ew3, eb3, db3 = _make_params(k3, input_dim_list=[128, 64, 32], batch=300)
    out3 = jax.block_until_ready(linear_ae_forward(x3, ew3, eb3, db3))
    ref3 = _reference_forward(x3, ew3, eb3, db3)
    assert out3.shape == ref3.shape
    assert jnp.allclose(out3, ref3, atol=3e-2, rtol=3e-2), "mismatch vs reference (case 3)"

    print("KERNEL_OK")
</pallas_src>

<mosaic_0001>
module attributes {stable_mosaic.version = 11 : i64} {
  func.func @_linear_ae_kernel(%arg0: i32, %arg1: memref<8x128xf32, #tpu.memory_space<vmem>>, %arg2: memref<128x128xf32, #tpu.memory_space<vmem>>, %arg3: memref<128x128xf32, #tpu.memory_space<vmem>>, %arg4: memref<128x128xf32, #tpu.memory_space<vmem>>, %arg5: memref<128x128xf32, #tpu.memory_space<vmem>>, %arg6: memref<4x128xf32, #tpu.memory_space<vmem>>, %arg7: memref<8x128xf32, #tpu.memory_space<vmem>>) attributes {dimension_semantics = [#tpu.dimension_semantics<parallel>], iteration_bounds = array<i64: 1>, scalar_prefetch = 0 : i64, scratch_operands = 0 : i64, tpu.core_type = #tpu.core_type<tc>, window_params = [{transform_indices = @transform_0, window_bounds = array<i64: 8, 128>}, {pipeline_mode = #tpu.pipeline_mode<synchronous>, transform_indices = @transform_1, window_bounds = array<i64: 128, 128>}, {pipeline_mode = #tpu.pipeline_mode<synchronous>, transform_indices = @transform_2, window_bounds = array<i64: 128, 128>}, {pipeline_mode = #tpu.pipeline_mode<synchronous>, transform_indices = @transform_3, window_bounds = array<i64: 128, 128>}, {pipeline_mode = #tpu.pipeline_mode<synchronous>, transform_indices = @transform_4, window_bounds = array<i64: 128, 128>}, {pipeline_mode = #tpu.pipeline_mode<synchronous>, transform_indices = @transform_5, window_bounds = array<i64: 4, 128>}, {transform_indices = @transform_6, window_bounds = array<i64: 8, 128>}]} {
    %c0 = arith.constant 0 : index
    %c0_0 = arith.constant 0 : index
    %0 = vector.load %arg1[%c0, %c0_0] : memref<8x128xf32, #tpu.memory_space<vmem>>, vector<8x128xf32>
    %c0_1 = arith.constant 0 : index
    %c0_2 = arith.constant 0 : index
    %1 = vector.load %arg2[%c0_1, %c0_2] : memref<128x128xf32, #tpu.memory_space<vmem>>, vector<128x128xf32>
    %cst = arith.constant dense<0.000000e+00> : vector<8x128xf32>
    %2 = tpu.matmul %0, %1, %cst {dimension_numbers = #tpu.dot_dimension_numbers<[1], [0], [0], [1], [0, 0, 1, 1], [], []>} : vector<8x128xf32>, vector<128x128xf32>, vector<8x128xf32> -> vector<8x128xf32>
    %c0_3 = arith.constant 0 : index
    %c0_4 = arith.constant 0 : index
    %3 = vector.load %arg6[%c0_3, %c0_4] : memref<4x128xf32, #tpu.memory_space<vmem>>, vector<1x128xf32>
    %4 = vector.broadcast %3 : vector<1x128xf32> to vector<8x128xf32>
    %5 = arith.addf %2, %4 : vector<8x128xf32>
    %cst_5 = arith.constant 0.000000e+00 : f32
    %6 = vector.broadcast %cst_5 : f32 to vector<8x128xf32>
    %7 = arith.maximumf %5, %6 : vector<8x128xf32>
    %c0_6 = arith.constant 0 : index
    %c0_7 = arith.constant 0 : index
    %8 = vector.load %arg3[%c0_6, %c0_7] : memref<128x128xf32, #tpu.memory_space<vmem>>, vector<128x128xf32>
    %cst_8 = arith.constant dense<0.000000e+00> : vector<8x128xf32>
    %9 = tpu.matmul %7, %8, %cst_8 {dimension_numbers = #tpu.dot_dimension_numbers<[1], [0], [0], [1], [0, 0, 1, 1], [], []>} : vector<8x128xf32>, vector<128x128xf32>, vector<8x128xf32> -> vector<8x128xf32>
    %c1 = arith.constant 1 : index
    %c0_9 = arith.constant 0 : index
    %10 = vector.load %arg6[%c1, %c0_9] : memref<4x128xf32, #tpu.memory_space<vmem>>, vector<1x128xf32>
    %11 = vector.broadcast %10 : vector<1x128xf32> to vector<8x128xf32>
    %12 = arith.addf %9, %11 : vector<8x128xf32>
    %cst_10 = arith.constant 0.000000e+00 : f32
    %13 = vector.broadcast %cst_10 : f32 to vector<8x128xf32>
    %14 = arith.maximumf %12, %13 : vector<8x128xf32>
    %c0_11 = arith.constant 0 : index
    %c0_12 = arith.constant 0 : index
    %15 = vector.load %arg5[%c0_11, %c0_12] : memref<128x128xf32, #tpu.memory_space<vmem>>, vector<128x128xf32>
    %cst_13 = arith.constant dense<0.000000e+00> : vector<8x128xf32>
    %16 = tpu.matmul %14, %15, %cst_13 {dimension_numbers = #tpu.dot_dimension_numbers<[1], [0], [0], [1], [0, 0, 1, 1], [], []>} : vector<8x128xf32>, vector<128x128xf32>, vector<8x128xf32> -> vector<8x128xf32>
    %c2 = arith.constant 2 : index
    %c0_14 = arith.constant 0 : index
    %17 = vector.load %arg6[%c2, %c0_14] : memref<4x128xf32, #tpu.memory_space<vmem>>, vector<1x128xf32>
    %18 = vector.broadcast %17 : vector<1x128xf32> to vector<8x128xf32>
    %19 = arith.addf %16, %18 : vector<8x128xf32>
    %cst_15 = arith.constant 0.000000e+00 : f32
    %20 = vector.broadcast %cst_15 : f32 to vector<8x128xf32>
    %21 = arith.maximumf %19, %20 : vector<8x128xf32>
    %c0_16 = arith.constant 0 : index
    %c0_17 = arith.constant 0 : index
    %22 = vector.load %arg4[%c0_16, %c0_17] : memref<128x128xf32, #tpu.memory_space<vmem>>, vector<128x128xf32>
    %cst_18 = arith.constant dense<0.000000e+00> : vector<8x128xf32>
    %23 = tpu.matmul %21, %22, %cst_18 {dimension_numbers = #tpu.dot_dimension_numbers<[1], [0], [0], [1], [0, 0, 1, 1], [], []>} : vector<8x128xf32>, vector<128x128xf32>, vector<8x128xf32> -> vector<8x128xf32>
    %c3 = arith.constant 3 : index
    %c0_19 = arith.constant 0 : index
    %24 = vector.load %arg6[%c3, %c0_19] : memref<4x128xf32, #tpu.memory_space<vmem>>, vector<1x128xf32>
    %25 = vector.broadcast %24 : vector<1x128xf32> to vector<8x128xf32>
    %26 = arith.addf %23, %25 : vector<8x128xf32>
    %27 = arith.negf %26 : vector<8x128xf32>
    %28 = math.exp %27 : vector<8x128xf32>
    %cst_20 = arith.constant 1.000000e+00 : f32
    %29 = vector.broadcast %cst_20 : f32 to vector<8x128xf32>
    %30 = arith.addf %29, %28 : vector<8x128xf32>
    %31 = arith.divf %29, %30 : vector<8x128xf32>
    %c0_21 = arith.constant 0 : index
    %c0_22 = arith.constant 0 : index
    %32 = vector.load %arg7[%c0_21, %c0_22] : memref<8x128xf32, #tpu.memory_space<vmem>>, vector<8x128xf32>
    tpu.vector_store %arg7[%c0_21, %c0_22], %31 {strides = array<i32>} : memref<8x128xf32, #tpu.memory_space<vmem>>, vector<8x128xf32>,
    return
  }
  func.func @transform_0(%arg0: i32) -> (i32, i32) {
    %c0_i32 = arith.constant 0 : i32
    %c0_i32_0 = arith.constant 0 : i32
    return %arg0, %c0_i32 : i32, i32
  }
  func.func @transform_1(%arg0: i32) -> (i32, i32) {
    %c0_i32 = arith.constant 0 : i32
    %c0_i32_0 = arith.constant 0 : i32
    %c0_i32_1 = arith.constant 0 : i32
    return %c0_i32, %c0_i32_0 : i32, i32
  }
  func.func @transform_2(%arg0: i32) -> (i32, i32) {
    %c0_i32 = arith.constant 0 : i32
    %c0_i32_0 = arith.constant 0 : i32
    %c0_i32_1 = arith.constant 0 : i32
    return %c0_i32, %c0_i32_0 : i32, i32
  }
  func.func @transform_3(%arg0: i32) -> (i32, i32) {
    %c0_i32 = arith.constant 0 : i32
    %c0_i32_0 = arith.constant 0 : i32
    %c0_i32_1 = arith.constant 0 : i32
    return %c0_i32, %c0_i32_0 : i32, i32
  }
  func.func @transform_4(%arg0: i32) -> (i32, i32) {
    %c0_i32 = arith.constant 0 : i32
    %c0_i32_0 = arith.constant 0 : i32
    %c0_i32_1 = arith.constant 0 : i32
    return %c0_i32, %c0_i32_0 : i32, i32
  }
  func.func @transform_5(%arg0: i32) -> (i32, i32) {
    %c0_i32 = arith.constant 0 : i32
    %c0_i32_0 = arith.constant 0 : i32
    %c0_i32_1 = arith.constant 0 : i32
    return %c0_i32, %c0_i32_0 : i32, i32
  }
  func.func @transform_6(%arg0: i32) -> (i32, i32) {
    %c0_i32 = arith.constant 0 : i32
    %c0_i32_0 = arith.constant 0 : i32
    return %arg0, %c0_i32 : i32, i32
  }
}

</mosaic_0001>

<bundles_post_ra>
// kernel: tpu_custom_call.1
= control target key start
LH: loop header
LB: loop body
LE: loop exit
PB: predicated region body
PF: predicated region fallthrough
CT: control target
= control target key end

     0   :  { %11 = vsyncpa [#allocation3], 0  ;;  %s1128_s0 = inlined_call_operand.hbm [shape: f32[8,128], index: 0, kind: input, shape index: {}]   ;;  %s1129_s1 = inlined_call_operand.hbm [shape: f32[128,128], index: 1, kind: input, shape index: {}]   ;;  %s1130_s2 = inlined_call_operand.hbm [shape: f32[128,128], index: 2, kind: input, shape index: {}]   ;;  %s1131_s3 = inlined_call_operand.hbm [shape: f32[128,128], index: 3, kind: input, shape index: {}]   ;;  %s1132_s4 = inlined_call_operand.hbm [shape: f32[128,128], index: 4, kind: input, shape index: {}]   ;;  %s1133_s5 = inlined_call_operand.vmem [shape: f32[4,128], index: 5, kind: input, shape index: {}]   ;;  %s1134_s6 = inlined_call_operand.hbm [shape: f32[8,128], index: 6, kind: output, shape index: {}]  }
   0x1   :  { %12 = vsyncpa [#allocation6], 0 }
   0x2   :  { %13 = vsyncpa [#allocation9], 0 }
   0x3   :  { %14 = vsyncpa [#allocation4], 0  ;;  %s946_s21 = smov [#allocation5]   ;;  %s806_s25 = scalar_lea.hbm %s1129_s1, 2048 }
   0x4   :  { %s30_s22 = sshll.u32 %s946_s21, 4  ;;  %p807_p0 = scmp.ne.s32.totalorder %s1129_s1, %s806_s25  ;;  %s31_s22 = int_to_ptr.vmem [resolvable:$true] %s30_s22 }
   0x5   :  { %p810_p1 = scmp.lt.u32.totalorder %s806_s25, %s1129_s1 }
   0x7   :  { %p812_p2 = pnand %p810_p1, %p807_p0 }
   0x9   :  { %815 = shalt.err (!%p812_p2)
}
   0xa   :  { %s816_s30 = scalar_lea.vmem %s31_s22, 2048  ;;  %p821_p4 = scmp.lt.s32.totalorder %s31_s22, %s31_s22 }
   0xb   :  { %p817_p3 = scmp.ne.s32.totalorder %s31_s22, %s816_s30  ;;  %p822_p5 = scmp.lt.s32.totalorder %s816_s30, %s816_s30 }
   0xd   :  { %p823_p6 = por %p822_p5, %p821_p4 }
   0xf   :  { %p824_p7 = pnand %p823_p6, %p817_p3 }
  0x11   :  { %827 = shalt.err (!%p824_p7)
}
  0x12   :  { %s947_s7 = smov 128   ;;  %s948_s8 = smov 8  }
  0x13   :  { %36 = dma.hbm_to_vmem [thread:$0]  %s1129_s1, 2048, %s31_s22, [#allocation6], %s947_s7, %s947_s7, %s948_s8  }
  0x14   :  { %s949_s11 = smov [#allocation8]   ;;  %s950_s13 = smov [#allocation2]  }
  0x15   :  { %s54_s12 = sshll.u32 %s949_s11, 4  ;;  %s21_s14 = sshll.u32 %s950_s13, 4  ;;  %s55_s12 = int_to_ptr.vmem [resolvable:$true] %s54_s12  ;;  %s22_s14 = int_to_ptr.vmem [resolvable:$true] %s21_s14 }
  0x16   :  { %s828_s17 = scalar_lea.hbm %s1131_s3, 2048 }
  0x17   :  { %p829_p8 = scmp.ne.s32.totalorder %s1131_s3, %s828_s17  ;;  %p832_p9 = scmp.lt.u32.totalorder %s828_s17, %s1131_s3 }
  0x19   :  { %p834_p10 = pnand %p832_p9, %p829_p8 }
  0x1b   :  { %837 = shalt.err (!%p834_p10)
}
  0x1c   :  { %s838_s1 = scalar_lea.vmem %s55_s12, 2048  ;;  %p843_p12 = scmp.lt.s32.totalorder %s55_s12, %s55_s12 }
  0x1d   :  { %p839_p11 = scmp.ne.s32.totalorder %s55_s12, %s838_s1  ;;  %p844_p13 = scmp.lt.s32.totalorder %s838_s1, %s838_s1 }
  0x1f   :  { %p845_p0 = por %p844_p13, %p843_p12 }
  0x21   :  { %p846_p1 = pnand %p845_p0, %p839_p11 }
  0x23   :  { %849 = shalt.err (!%p846_p1)
}
  0x24   :  { %60 = dma.hbm_to_vmem [thread:$0]  %s1131_s3, 2048, %s55_s12, [#allocation9], %s947_s7, %s947_s7, %s948_s8  }
  0x25   :  { %s850_s26 = scalar_lea.hbm %s1128_s0, 128 }
  0x26   :  { %p851_p2 = scmp.ne.s32.totalorder %s1128_s0, %s850_s26  ;;  %p854_p3 = scmp.lt.u32.totalorder %s850_s26, %s1128_s0 }
  0x28   :  { %p856_p4 = pnand %p854_p3, %p851_p2 }
  0x2a   :  { %859 = shalt.err (!%p856_p4)
}
  0x2b   :  { %s860_s9 = scalar_lea.vmem %s22_s14, 128  ;;  %p865_p6 = scmp.lt.s32.totalorder %s22_s14, %s22_s14 }
  0x2c   :  { %p861_p5 = scmp.ne.s32.totalorder %s22_s14, %s860_s9  ;;  %p866_p7 = scmp.lt.s32.totalorder %s860_s9, %s860_s9 }
  0x2e   :  { %p867_p8 = por %p866_p7, %p865_p6 }
  0x30   :  { %p868_p9 = pnand %p867_p8, %p861_p5 }
  0x32   :  { %871 = shalt.err (!%p868_p9)
}
  0x33   :  { %24 = dma.hbm_to_vmem [thread:$0]  %s1128_s0, 128, %s22_s14, [#allocation3]  }
  0x34   :  { %s951_s11 = smov [#allocation7]   ;;  %s952_s13 = smov [#allocation10]  }
  0x35   :  { %s42_s12 = sshll.u32 %s951_s11, 4  ;;  %s66_s15 = sshll.u32 %s952_s13, 4  ;;  %s43_s12 = int_to_ptr.vmem [resolvable:$true] %s42_s12  ;;  %s67_s15 = int_to_ptr.vmem [resolvable:$true] %s66_s15 }
  0x36   :  { %s872_s18 = scalar_lea.hbm %s1130_s2, 2048 }
  0x37   :  { %p873_p10 = scmp.ne.s32.totalorder %s1130_s2, %s872_s18  ;;  %p876_p11 = scmp.lt.u32.totalorder %s872_s18, %s1130_s2 }
  0x39   :  { %p878_p12 = pnand %p876_p11, %p873_p10 }
  0x3b   :  { %881 = shalt.err (!%p878_p12)
}
  0x3c   :  { %s882_s0 = scalar_lea.vmem %s43_s12, 2048  ;;  %p887_p0 = scmp.lt.s32.totalorder %s43_s12, %s43_s12 }
  0x3d   :  { %p883_p13 = scmp.ne.s32.totalorder %s43_s12, %s882_s0  ;;  %p888_p1 = scmp.lt.s32.totalorder %s882_s0, %s882_s0 }
  0x3f   :  { %p889_p2 = por %p888_p1, %p887_p0 }
  0x41   :  { %p890_p3 = pnand %p889_p2, %p883_p13 }
  0x43   :  { %893 = shalt.err (!%p890_p3)
}
  0x44   :  { %48 = dma.hbm_to_vmem [thread:$0]  %s1130_s2, 2048, %s43_s12, [#allocation6], %s947_s7, %s947_s7, %s948_s8  }
  0x45   :  { %s894_s25 = scalar_lea.hbm %s1132_s4, 2048 }
  0x46   :  { %p895_p4 = scmp.ne.s32.totalorder %s1132_s4, %s894_s25  ;;  %p898_p5 = scmp.lt.u32.totalorder %s894_s25, %s1132_s4 }
  0x48   :  { %p900_p6 = pnand %p898_p5, %p895_p4 }
  0x4a   :  { %903 = shalt.err (!%p900_p6)
}
  0x4b   :  { %s904_s30 = scalar_lea.vmem %s67_s15, 2048  ;;  %p909_p8 = scmp.lt.s32.totalorder %s67_s15, %s67_s15 }
  0x4c   :  { %p905_p7 = scmp.ne.s32.totalorder %s67_s15, %s904_s30  ;;  %p910_p9 = scmp.lt.s32.totalorder %s904_s30, %s904_s30 }
  0x4e   :  { %p911_p10 = por %p910_p9, %p909_p8 }
  0x50   :  { %p912_p11 = pnand %p911_p10, %p905_p7 }
  0x52   :  { %915 = shalt.err (!%p912_p11)
}
  0x53   :  { %72 = dma.hbm_to_vmem [thread:$0]  %s1132_s4, 2048, %s67_s15, [#allocation9], %s947_s7, %s947_s7, %s948_s8  }
  0x54   :  { %938 = dma.done.wait [#allocation3], 128  }
  0x55   :  { %939 = vsyncadd [#allocation3], 4294967168 }
  0x56   :  { %940 = dma.done.wait [#allocation6], 4096  }
  0x57   :  { %941 = vsyncadd [#allocation6], 4294963200 }
  0x58   :  { %942 = dma.done.wait [#allocation9], 4096  }
  0x59   :  { %943 = vsyncadd [#allocation9], 4294963200  ;;  %v953_v0 = vmov 0.0|0.0   ;;  %vm954_vm0 = vmmov 0   ;;  %v955_v1 = vmov 0.0   ;;  %v91_v2 = vld [vmem:[#allocation5] sm:$0xff] }
  0x5a   :  { %695 = vmatprep.subr.bf16.mxu0 %v953_v0  ;;  %587 = vmatprep.mubr.msk.f32.mxu0 %vm954_vm0, %v955_v1  ;;  %v92_v3 = vld [vmem:[#allocation5 + $0x8] sm:$0xff]  ;;  %v93_v4 = vld [vmem:[#allocation5 + $0x10] sm:$0xff]  ;;  %v94_v6 = vld [vmem:[#allocation5 + $0x18] sm:$0xff]  ;;  %s956_s15 = smov [#allocation11]  }
  0x5b   :  { %719 = vmatprep.subr.bf16.mxu1 %v953_v0  ;;  %622 = vmatprep.mubr.msk.f32.mxu1 %vm954_vm0, %v955_v1  ;;  %v696_v5 = vpack.c.bf16 %v92_v3, %v91_v2  ;;  %v699_v7 = vpack.c.bf16 %v94_v6, %v93_v4  ;;  %v95_v8 = vld [vmem:[#allocation5 + $0x20] sm:$0xff]  ;;  %v96_v9 = vld [vmem:[#allocation5 + $0x28] sm:$0xff]  ;;  %v185_v12 = vld [vmem:[#allocation7 + $0x10] sm:$0xff]  ;;  %s471_s16 = sshll.u32 %s956_s15, 4  ;;  %s472_s16 = int_to_ptr.vmem [resolvable:$true] %s471_s16 }
  0x5c   :  { %v183_v10 = vld [vmem:[#allocation7] sm:$0xff]  ;;  %v184_v11 = vld [vmem:[#allocation7 + $0x8] sm:$0xff]  ;;  %v186_v13 = vld [vmem:[#allocation7 + $0x18] sm:$0xff]  ;;  %v702_v14 = vpack.c.bf16 %v96_v9, %v95_v8  ;;  %s916_s17 = scalar_lea.vmem %s472_s16, 128  ;;  %p921_p13 = scmp.lt.s32.totalorder %s472_s16, %s472_s16 }
  0x5d   :  { %697 = vmatpush3.bf16.msra.mxu0 %v696_v5  ;;  %v720_v15 = vpack.c.bf16 %v184_v11, %v183_v10  ;;  %v97_v16 = vld [vmem:[#allocation5 + $0x30] sm:$0xff]  ;;  %v98_v17 = vld [vmem:[#allocation5 + $0x38] sm:$0xff]  ;;  %v723_v18 = vpack.c.bf16 %v186_v13, %v185_v12  ;;  %v187_v19 = vld [vmem:[#allocation7 + $0x20] sm:$0xff]  ;;  %p917_p12 = scmp.ne.s32.totalorder %s472_s16, %s916_s17  ;;  %p922_p0 = scmp.lt.s32.totalorder %s916_s17, %s916_s17 }
  0x5e   :  { %698 = vmatprep.subr.bf16.mxu0 %v953_v0  ;;  %v188_v20 = vld [vmem:[#allocation7 + $0x28] sm:$0xff]  ;;  %v705_v21 = vpack.c.bf16 %v98_v17, %v97_v16  ;;  %v99_v22 = vld [vmem:[#allocation5 + $0x40] sm:$0xff]  ;;  %v189_v25 = vld [vmem:[#allocation7 + $0x30] sm:$0xff] }
  0x5f   :  { %721 = vmatpush3.bf16.msra.mxu1 %v720_v15  ;;  %v100_v23 = vld [vmem:[#allocation5 + $0x48] sm:$0xff]  ;;  %v726_v24 = vpack.c.bf16 %v188_v20, %v187_v19  ;;  %v190_v26 = vld [vmem:[#allocation7 + $0x38] sm:$0xff]  ;;  %v101_v28 = vld [vmem:[#allocation5 + $0x50] sm:$0xff]  ;;  %p923_p1 = por %p922_p0, %p921_p13 }
  0x60   :  { %722 = vmatprep.subr.bf16.mxu1 %v953_v0  ;;  %v708_v27 = vpack.c.bf16 %v100_v23, %v99_v22  ;;  %v102_v29 = vld [vmem:[#allocation5 + $0x58] sm:$0xff]  ;;  %v729_v30 = vpack.c.bf16 %v190_v26, %v189_v25  ;;  %v191_v31 = vld [vmem:[#allocation7 + $0x40] sm:$0xff]  ;;  %v192_v32 = vld [vmem:[#allocation7 + $0x48] sm:$0xff] }
  0x61   :  { %700 = vmatpush3.bf16.msra.mxu0 %v699_v7  ;;  %v711_v33 = vpack.c.bf16 %v102_v29, %v101_v28  ;;  %v103_v34 = vld [vmem:[#allocation5 + $0x60] sm:$0xff]  ;;  %v104_v35 = vld [vmem:[#allocation5 + $0x68] sm:$0xff]  ;;  %v732_v36 = vpack.c.bf16 %v192_v32, %v191_v31  ;;  %v193_v37 = vld [vmem:[#allocation7 + $0x50] sm:$0xff]  ;;  %p924_p2 = pnand %p923_p1, %p917_p12 }
  0x62   :  { %701 = vmatprep.subr.bf16.mxu0 %v953_v0  ;;  %v194_v38 = vld [vmem:[#allocation7 + $0x58] sm:$0xff]  ;;  %v714_v39 = vpack.c.bf16 %v104_v35, %v103_v34  ;;  %v105_v40 = vld [vmem:[#allocation5 + $0x70] sm:$0xff]  ;;  %v195_v43 = vld [vmem:[#allocation7 + $0x60] sm:$0xff] }
  0x63   :  { %724 = vmatpush3.bf16.msra.mxu1 %v723_v18  ;;  %v106_v41 = vld [vmem:[#allocation5 + $0x78] sm:$0xff]  ;;  %v735_v42 = vpack.c.bf16 %v194_v38, %v193_v37  ;;  %v196_v44 = vld [vmem:[#allocation7 + $0x68] sm:$0xff]  ;;  %v197_v48 = vld [vmem:[#allocation7 + $0x70] sm:$0xff] }
  0x64   :  { %725 = vmatprep.subr.bf16.mxu1 %v953_v0  ;;  %v717_v45 = vpack.c.bf16 %v106_v41, %v105_v40  ;;  %v738_v46 = vpack.c.bf16 %v196_v44, %v195_v43  ;;  %v90_v47 = vld [vmem:[#allocation2] sm:$0xff]  ;;  %v275_v51 = vld [vmem:[#allocation10] sm:$0xff]  ;;  %v276_v52 = vld [vmem:[#allocation10 + $0x8] sm:$0xff] }
  0x65   :  { %703 = vmatpush3.bf16.msra.mxu0 %v702_v14  ;;  %v198_v49 = vld [vmem:[#allocation7 + $0x78] sm:$0xff]  ;;  %v277_v53 = vld [vmem:[#allocation10 + $0x10] sm:$0xff]  ;;  %v744_v54 = vpack.c.bf16 %v276_v52, %v275_v51  ;;  %v279_v57 = vld [vmem:[#allocation10 + $0x20] sm:$0xff] }
  0x66   :  { %704 = vmatprep.subr.bf16.mxu0 %v953_v0  ;;  %v741_v50 = vpack.c.bf16 %v198_v49, %v197_v48  ;;  %v278_v55 = vld [vmem:[#allocation10 + $0x18] sm:$0xff]  ;;  %v280_v58 = vld [vmem:[#allocation10 + $0x28] sm:$0xff]  ;;  %v281_v60 = vld [vmem:[#allocation10 + $0x30] sm:$0xff] }
  0x67   :  { %727 = vmatpush3.bf16.msra.mxu1 %v726_v24  ;;  %v747_v56 = vpack.c.bf16 %v278_v55, %v277_v53  ;;  %v750_v59 = vpack.c.bf16 %v280_v58, %v279_v57  ;;  %v282_v61 = vld [vmem:[#allocation10 + $0x38] sm:$0xff]  ;;  %v283_v63 = vld [vmem:[#allocation10 + $0x40] sm:$0xff]  ;;  %v284_v2 = vld [vmem:[#allocation10 + $0x48] sm:$0xff] }
  0x68   :  { %728 = vmatprep.subr.bf16.mxu1 %v953_v0  ;;  %v753_v62 = vpack.c.bf16 %v282_v61, %v281_v60  ;;  %v756_v3 = vpack.c.bf16 %v284_v2, %v283_v63  ;;  %v285_v4 = vld [vmem:[#allocation10 + $0x50] sm:$0xff]  ;;  %v286_v5 = vld [vmem:[#allocation10 + $0x58] sm:$0xff]  ;;  %v287_v7 = vld [vmem:[#allocation10 + $0x60] sm:$0xff] }
  0x69   :  { %706 = vmatpush3.bf16.msra.mxu0 %v705_v21  ;;  %v759_v6 = vpack.c.bf16 %v286_v5, %v285_v4  ;;  %v288_v8 = vld [vmem:[#allocation10 + $0x68] sm:$0xff]  ;;  %v482_v10 = vld [vmem:[%s1133_s5] ss:$0 sm:$0xff]  ;;  %v289_v15 = vld [vmem:[#allocation10 + $0x70] sm:$0xff] }
  0x6a   :  { %707 = vmatprep.subr.bf16.mxu0 %v953_v0  ;;  %v762_v9 = vpack.c.bf16 %v288_v8, %v287_v7  ;;  %v290_v16 = vld [vmem:[#allocation10 + $0x78] sm:$0xff]  ;;  %v367_v18 = vld [vmem:[#allocation8] sm:$0xff]  ;;  %v368_v19 = vld [vmem:[#allocation8 + $0x8] sm:$0xff] }
  0x6b   :  { %730 = vmatpush3.bf16.msra.mxu1 %v729_v30  ;;  %v765_v17 = vpack.c.bf16 %v290_v16, %v289_v15  ;;  %v369_v20 = vld [vmem:[#allocation8 + $0x10] sm:$0xff]  ;;  %v768_v21 = vpack.c.bf16 %v368_v19, %v367_v18  ;;  %v370_v22 = vld [vmem:[#allocation8 + $0x18] sm:$0xff]  ;;  %v371_v24 = vld [vmem:[#allocation8 + $0x20] sm:$0xff] }
  0x6c   :  { %731 = vmatprep.subr.bf16.mxu1 %v953_v0  ;;  %v771_v23 = vpack.c.bf16 %v370_v22, %v369_v20  ;;  %v372_v25 = vld [vmem:[#allocation8 + $0x28] sm:$0xff]  ;;  %v375_v29 = vld [vmem:[#allocation8 + $0x40] sm:$0xff]  ;;  %v377_v32 = vld [vmem:[#allocation8 + $0x50] sm:$0xff] }
  0x6d   :  { %709 = vmatpush3.bf16.msra.mxu0 %v708_v27  ;;  %v774_v26 = vpack.c.bf16 %v372_v25, %v371_v24  ;;  %v374_v27 = vld [vmem:[#allocation8 + $0x38] sm:$0xff]  ;;  %v376_v30 = vld [vmem:[#allocation8 + $0x48] sm:$0xff]  ;;  %v379_v35 = vld [vmem:[#allocation8 + $0x60] sm:$0xff] }
  0x6e   :  { %710 = vmatprep.subr.bf16.mxu0 %v953_v0  ;;  %v780_v31 = vpack.c.bf16 %v376_v30, %v375_v29  ;;  %v483_v38 = vld [vmem:[%s1133_s5 + $0x1] ss:$0 sm:$0xff]  ;;  %v381_v43 = vld [vmem:[#allocation8 + $0x70] sm:$0xff] }
  0x6f   :  { %733 = vmatpush3.bf16.msra.mxu1 %v732_v36  ;;  %v380_v36 = vld [vmem:[#allocation8 + $0x68] sm:$0xff]  ;;  %v382_v44 = vld [vmem:[#allocation8 + $0x78] sm:$0xff] }
  0x70   :  { %734 = vmatprep.subr.bf16.mxu1 %v953_v0  ;;  %v786_v37 = vpack.c.bf16 %v380_v36, %v379_v35 }
  0x71   :  { %712 = vmatpush3.bf16.msra.mxu0 %v711_v33  ;;  %v378_v33 = vld [vmem:[#allocation8 + $0x58] sm:$0xff] }
  0x72   :  { %713 = vmatprep.subr.bf16.mxu0 %v953_v0  ;;  %v783_v34 = vpack.c.bf16 %v378_v33, %v377_v32 }
  0x73   :  { %736 = vmatpush3.bf16.msra.mxu1 %v735_v42 }
  0x74   :  { %737 = vmatprep.subr.bf16.mxu1 %v953_v0 }
  0x75   :  { %715 = vmatpush3.bf16.msra.mxu0 %v714_v39 }
  0x76   :  { %716 = vmatprep.subr.bf16.mxu0 %v953_v0 }
  0x77   :  { %739 = vmatpush3.bf16.msra.mxu1 %v738_v46  ;;  %v484_v46 = vld [vmem:[%s1133_s5 + $0x2] ss:$0 sm:$0xff] }
  0x78   :  { %740 = vmatprep.subr.bf16.mxu1 %v953_v0 }
  0x79   :  { %718 = vmatpush3.bf16.msra.mxu0 %v717_v45  ;;  %v789_v45 = vpack.c.bf16 %v382_v44, %v381_v43 }
  0x7a   :  { %743 = vmatprep.subr.bf16.mxu0 %v953_v0 }
  0x7b   :  { %742 = vmatpush3.bf16.msra.mxu1 %v741_v50  ;;  %v485_v50 = vld [vmem:[%s1133_s5 + $0x3] ss:$0 sm:$0xff] }
  0x7c   :  { %588 = vmatmul.mubr.f32.vlgmr.msra.gmra.mrb[0].mxu0 %v90_v47  ;;  %767 = vmatprep.subr.bf16.mxu1 %v953_v0 }
  0x7d   :  { %657 = vmatprep.mubr.msk.f32.mxu0 %vm954_vm0, %v955_v1  ;;  %745 = vmatpush3.bf16.msra.mxu0 %v744_v54 }
  0x7e   :  { %746 = vmatprep.subr.bf16.mxu0 %v953_v0 }
  0x81   :  { %748 = vmatpush3.bf16.msra.mxu0 %v747_v56 }
  0x82   :  { %749 = vmatprep.subr.bf16.mxu0 %v953_v0 }
  0x85   :  { %751 = vmatpush3.bf16.msra.mxu0 %v750_v59 }
  0x86   :  { %752 = vmatprep.subr.bf16.mxu0 %v953_v0 }
  0x89   :  { %754 = vmatpush3.bf16.msra.mxu0 %v753_v62 }
  0x8a   :  { %755 = vmatprep.subr.bf16.mxu0 %v953_v0 }
  0x8d   :  { %757 = vmatpush3.bf16.msra.mxu0 %v756_v3 }
  0x8e   :  { %758 = vmatprep.subr.bf16.mxu0 %v953_v0 }
  0x91   :  { %760 = vmatpush3.bf16.msra.mxu0 %v759_v6 }
  0x92   :  { %761 = vmatprep.subr.bf16.mxu0 %v953_v0 }
  0x95   :  { %763 = vmatpush3.bf16.msra.mxu0 %v762_v9 }
  0x96   :  { %764 = vmatprep.subr.bf16.mxu0 %v953_v0 }
  0x99   :  { %766 = vmatpush3.bf16.msra.mxu0 %v765_v17 }
 0x14f   :  { %v178_v11 = vpop.f32.mrb[0].mxu0 }
 0x150   :  { %v179_v12 = vadd.f32 %v482_v10, %v178_v11  ;;  %v589_v13 = vpop.f32.mrb[1].mxu0 }
 0x152   :  { %v182_v14 = vmax.f32 %v179_v12, 0.0 }
 0x154   :  { %623 = vmatmul.mubr.f32.vlgmr.msra.gmra.mrb[0].mxu1 %v182_v14 }
 0x155   :  { %692 = vmatprep.mubr.msk.f32.mxu1 %vm954_vm0, %v955_v1  ;;  %769 = vmatpush3.bf16.msra.mxu1 %v768_v21  ;;  %v373_v1 = vld [vmem:[#allocation8 + $0x30] sm:$0xff] }
 0x156   :  { %770 = vmatprep.subr.bf16.mxu1 %v953_v0  ;;  %v777_v28 = vpack.c.bf16 %v374_v27, %v373_v1 }
 0x159   :  { %772 = vmatpush3.bf16.msra.mxu1 %v771_v23 }
 0x15a   :  { %773 = vmatprep.subr.bf16.mxu1 %v953_v0 }
 0x15d   :  { %775 = vmatpush3.bf16.msra.mxu1 %v774_v26 }
 0x15e   :  { %776 = vmatprep.subr.bf16.mxu1 %v953_v0 }
 0x161   :  { %778 = vmatpush3.bf16.msra.mxu1 %v777_v28 }
 0x162   :  { %779 = vmatprep.subr.bf16.mxu1 %v953_v0 }
 0x165   :  { %781 = vmatpush3.bf16.msra.mxu1 %v780_v31 }
 0x166   :  { %782 = vmatprep.subr.bf16.mxu1 %v953_v0 }
 0x169   :  { %784 = vmatpush3.bf16.msra.mxu1 %v783_v34 }
 0x16a   :  { %785 = vmatprep.subr.bf16.mxu1 %v953_v0 }
 0x16d   :  { %787 = vmatpush3.bf16.msra.mxu1 %v786_v37 }
 0x16e   :  { %788 = vmatprep.subr.bf16.mxu1 %v953_v0 }
 0x171   :  { %790 = vmatpush3.bf16.msra.mxu1 %v789_v45 }
 0x227   :  { %v270_v39 = vpop.f32.mrb[0].mxu1 }
 0x228   :  { %v271_v40 = vadd.f32 %v483_v38, %v270_v39  ;;  %v624_v41 = vpop.f32.mrb[1].mxu1 }
 0x22a   :  { %v274_v42 = vmax.f32 %v271_v40, 0.0 }
 0x22c   :  { %658 = vmatmul.mubr.f32.vlgmr.msra.gmra.mrb[2].mxu0 %v274_v42 }
 0x2ff   :  { %v362_v47 = vpop.f32.mrb[2].mxu0 }
 0x300   :  { %v363_v48 = vadd.f32 %v484_v46, %v362_v47  ;;  %v659_v0 = vpop.f32.mrb[3].mxu0 }
 0x302   :  { %v366_v49 = vmax.f32 %v363_v48, 0.0 }
 0x304   :  { %693 = vmatmul.mubr.f32.vlgmr.msra.gmra.mrb[2].mxu1 %v366_v49 }
 0x3d7   :  { %v454_v51 = vpop.f32.mrb[2].mxu1 }
 0x3d8   :  { %v455_v52 = vadd.f32 %v485_v50, %v454_v51  ;;  %v694_v53 = vpop.f32.mrb[3].mxu1 }
 0x3da   :  { %v486_v54 = vmul.f32 -1.442695, %v455_v52 }
 0x3dc   :  { %802 = vpow2.f32 %v486_v54 }
 0x3e6   :  { %v803_v55 = vpop.eup %802 }
 0x3e7   :  { %v461_v56 = vadd.f32 1.0, %v803_v55 }
 0x3e9   :  { %804 = vrcp.f32 %v461_v56 }
 0x3f3   :  { %v805_v57 = vpop.eup %804 }
 0x3f4   :  { %464 = vst [vmem:[#allocation11] sm:$0xff] %v805_v57 }
 0x3f5   :  { %927 = shalt.err (!%p924_p2)
}
 0x3f6   :  { %s928_s19 = scalar_lea.hbm %s1134_s6, 128 }
 0x3f7   :  { %p929_p3 = scmp.ne.s32.totalorder %s1134_s6, %s928_s19  ;;  %p932_p4 = scmp.lt.u32.totalorder %s928_s19, %s1134_s6 }
 0x3f9   :  { %p934_p5 = pnand %p932_p4, %p929_p3 }
 0x3fb   :  { %937 = shalt.err (!%p934_p5)
}
 0x3fc   :  { %474 = dma.vmem_to_hbm [thread:$0]  %s472_s16, 128, %s1134_s6, [#allocation4]  }
 0x3fd   :  { %944 = dma.done.wait [#allocation4], 128  }
 0x3fe   :  { %945 = vsyncadd [#allocation4], 4294967168 }
 0x3ff   :  { %478 = vsyncpa [#allocation3], 1 }
 0x400   :  { %479 = vsyncpa [#allocation6], 1 }
 0x401   :  { %480 = vsyncpa [#allocation9], 1 }
 0x402   :  { %481 = vsyncpa [#allocation4], 1 }

</bundles_post_ra>
